<compile_context>
chip_gen: v6e
topology: v6e:2x2x1
jax: 0.10.0
libtpu: 0.0.40
codegen_flags: <defaults>
</compile_context>

<pallas_src>
import math

import jax
import jax.numpy as jnp
from jax.experimental import pallas as pl
from jax.experimental.pallas import tpu as pltpu

HIDDEN = 1024   # width of the l2/l3 hidden layer (lane axis)
CHUNK = 16      # rows processed per inner-loop step (keeps vreg pressure low)
TM_MAX = 256    # max rows of t per grid step


# ---------------------------------------------------------------------------
# Kernel
# ---------------------------------------------------------------------------
def gamma_kernel(scal_ref, w2_ref, b2_ref, w3_ref, t_ref, o_ref):
    # SMEM scalars: [softplus(w1), b1, A, B]  with gamma = A + B*(l1_t + h)
    w1 = scal_ref[0]
    b1 = scal_ref[1]
    aff_a = scal_ref[2]
    aff_b = scal_ref[3]

    w2 = w2_ref[...]   # (1, HIDDEN), already softplus'd in the wrapper
    b2 = b2_ref[...]   # (1, HIDDEN)
    w3 = w3_ref[...]   # (1, HIDDEN), already softplus'd in the wrapper

    n_chunks = t_ref.shape[0] // CHUNK

    @pl.loop(0, n_chunks)
    def _(c):
        off = pl.multiple_of(c * CHUNK, CHUNK)
        t = t_ref[pl.ds(off, CHUNK), :]                      # (CHUNK, 1)
        l1t = w1 * t + b1                                    # (CHUNK, 1)
        z = l1t * w2 + b2                                    # (CHUNK, HIDDEN)
        s = 1.0 / (1.0 + jnp.exp(-z))                        # sigmoid (EUP)
        h = jnp.sum(s * w3, axis=-1, keepdims=True)          # lane reduce (XLU)
        o_ref[pl.ds(off, CHUNK), :] = aff_a + aff_b * (l1t + h)


# ---------------------------------------------------------------------------
# Wrapper
# ---------------------------------------------------------------------------
def _pick_tile(n):
    tm = ((max(n, 1) + CHUNK - 1) // CHUNK) * CHUNK
    return min(tm, TM_MAX)


def gamma_network_forward(t, params):
    """t: (N, 1) float -> gamma: (N, 1) float32."""
    N = t.shape[0]
    t = t.astype(jnp.float32).reshape(N, 1)

    # ---- parameter-only preprocessing, hoisted out of the kernel ----
    w1p = jax.nn.softplus(params["w1"])[0, 0]                 # scalar
    b1 = params["b1"][0]
    w2p = jax.nn.softplus(params["w2"]).reshape(1, HIDDEN)    # (1, 1024)
    b2r = params["b2"].reshape(1, HIDDEN)
    w3p = jax.nn.softplus(params["w3"]).reshape(1, HIDDEN)
    b3 = params["b3"][0]
    g0 = params["gamma_0"][0]
    g1 = params["gamma_1"][0]

    def gamma_tilde_scalar(tval):
        # same elementwise/broadcast formulation the kernel uses
        l1 = w1p * tval + b1
        s = jax.nn.sigmoid(l1 * w2p + b2r)
        return l1 + jnp.sum(s * w3p) + b3

    gt0 = gamma_tilde_scalar(0.0)
    gt1 = gamma_tilde_scalar(1.0)
    aff_b = (g1 - g0) / (gt1 - gt0)
    aff_a = g0 + aff_b * (b3 - gt0)   # folds the l3 bias into the affine

    scal = jnp.stack([w1p, b1, aff_a, aff_b]).astype(jnp.float32)  # (4,)

    # ---- tiling ----
    tm = _pick_tile(N)
    n_pad = ((N + tm - 1) // tm) * tm
    t_p = jnp.zeros((n_pad, 1), jnp.float32).at[:N, :].set(t)

    out = pl.pallas_call(
        gamma_kernel,
        out_shape=jax.ShapeDtypeStruct((n_pad, 1), jnp.float32),
        grid=(n_pad // tm,),
        in_specs=[
            pl.BlockSpec(memory_space=pltpu.MemorySpace.SMEM),   # scalars
            pl.BlockSpec((1, HIDDEN), lambda i: (0, 0)),         # softplus(w2)
            pl.BlockSpec((1, HIDDEN), lambda i: (0, 0)),         # b2
            pl.BlockSpec((1, HIDDEN), lambda i: (0, 0)),         # softplus(w3)
            pl.BlockSpec((tm, 1), lambda i: (i, 0)),             # t block
        ],
        out_specs=pl.BlockSpec((tm, 1), lambda i: (i, 0)),
        compiler_params=pltpu.CompilerParams(
            dimension_semantics=("parallel",)),                  # v7x: 2 TCs
    )(scal, w2p, b2r, w3p, t_p)
    return out[:N]


# ---------------------------------------------------------------------------
# Init + pure-JAX reference (mirrors the torch module)
# ---------------------------------------------------------------------------
def init_params(key):
    """Deterministic init mirroring PositiveLinear.reset_parameters."""
    ks = jax.random.split(key, 6)

    def kaiming_uniform(k, out_f, in_f):
        bound = 1.0 / math.sqrt(in_f)   # kaiming_uniform_(a=sqrt(5))
        return jax.random.uniform(k, (out_f, in_f), jnp.float32, -bound, bound)

    def bias_init(k, out_f, in_f):
        bound = 1.0 / math.sqrt(in_f)
        return jax.random.uniform(k, (out_f,), jnp.float32, -bound, bound)

    offset = -2.0
    w1 = kaiming_uniform(ks[0], 1, 1) + offset          # l1.weight  (1,1)
    b1 = bias_init(ks[1], 1, 1)                         # l1.bias    (1,)
    w2 = kaiming_uniform(ks[2], HIDDEN, 1) + offset     # l2.weight  (1024,1)
    b2 = bias_init(ks[3], HIDDEN, 1)                    # l2.bias    (1024,)
    w3 = kaiming_uniform(ks[4], 1, HIDDEN) + offset     # l3.weight  (1,1024)
    b3 = bias_init(ks[5], 1, HIDDEN)                    # l3.bias    (1,)
    gamma_0 = jnp.array([-5.0], jnp.float32)
    gamma_1 = jnp.array([10.0], jnp.float32)
    return dict(w1=w1, b1=b1, w2=w2, b2=b2, w3=w3, b3=b3,
                gamma_0=gamma_0, gamma_1=gamma_1)


def gamma_network_reference(t, params):
    """Pure-JAX reference identical to the torch forward pass."""
    hp = jax.lax.Precision.HIGHEST
    w1 = jax.nn.softplus(params["w1"])   # (1,1)
    b1 = params["b1"]
    w2 = jax.nn.softplus(params["w2"])   # (1024,1)
    b2 = params["b2"]
    w3 = jax.nn.softplus(params["w3"])   # (1,1024)
    b3 = params["b3"]

    def gamma_tilde(x):
        l1_t = jnp.dot(x, w1.T, precision=hp) + b1              # (N,1)
        h = jax.nn.sigmoid(jnp.dot(l1_t, w2.T, precision=hp) + b2)  # (N,1024)
        return l1_t + jnp.dot(h, w3.T, precision=hp) + b3       # (N,1)

    gt0 = gamma_tilde(jnp.zeros_like(t))
    gt1 = gamma_tilde(jnp.ones_like(t))
    gtt = gamma_tilde(t)
    norm = (gtt - gt0) / (gt1 - gt0)
    return params["gamma_0"] + (params["gamma_1"] - params["gamma_0"]) * norm


if __name__ == "__main__":
    key = jax.random.PRNGKey(0)
    pkey, tkey = jax.random.split(key)
    params = init_params(pkey)

    # small batch (single tile) + a larger batch (multi-tile / multi-chunk)
    for n in (8, 300):
        t = jax.random.uniform(jax.random.fold_in(tkey, n), (n, 1), jnp.float32)
        gamma = jax.block_until_ready(gamma_network_forward(t, params))
        ref = gamma_network_reference(t, params)
        assert gamma.shape == (n, 1)
        err = float(jnp.max(jnp.abs(gamma - ref)))
        assert jnp.allclose(gamma, ref, atol=5e-4, rtol=5e-4), (n, err)

    print("KERNEL_OK")
</pallas_src>

<mosaic_0001>
module attributes {stable_mosaic.version = 11 : i64} {
  func.func @gamma_kernel(%arg0: i32, %arg1: memref<4xf32, #tpu.memory_space<smem>>, %arg2: memref<1x1024xf32, #tpu.memory_space<vmem>>, %arg3: memref<1x1024xf32, #tpu.memory_space<vmem>>, %arg4: memref<1x1024xf32, #tpu.memory_space<vmem>>, %arg5: memref<16x1xf32, #tpu.memory_space<vmem>>, %arg6: memref<16x1xf32, #tpu.memory_space<vmem>>) attributes {dimension_semantics = [#tpu.dimension_semantics<parallel>], iteration_bounds = array<i64: 1>, scalar_prefetch = 0 : i64, scratch_operands = 0 : i64, tpu.core_type = #tpu.core_type<tc>, window_params = [{transform_indices = @transform_0, window_bounds = array<i64: 4>}, {pipeline_mode = #tpu.pipeline_mode<synchronous>, transform_indices = @transform_1, window_bounds = array<i64: 1, 1024>}, {pipeline_mode = #tpu.pipeline_mode<synchronous>, transform_indices = @transform_2, window_bounds = array<i64: 1, 1024>}, {pipeline_mode = #tpu.pipeline_mode<synchronous>, transform_indices = @transform_3, window_bounds = array<i64: 1, 1024>}, {transform_indices = @transform_4, window_bounds = array<i64: 16, 1>}, {transform_indices = @transform_5, window_bounds = array<i64: 16, 1>}]} {
    %c0 = arith.constant 0 : index
    %0 = memref.load %arg1[%c0] : memref<4xf32, #tpu.memory_space<smem>>
    %c1 = arith.constant 1 : index
    %1 = memref.load %arg1[%c1] : memref<4xf32, #tpu.memory_space<smem>>
    %c2 = arith.constant 2 : index
    %2 = memref.load %arg1[%c2] : memref<4xf32, #tpu.memory_space<smem>>
    %c3 = arith.constant 3 : index
    %3 = memref.load %arg1[%c3] : memref<4xf32, #tpu.memory_space<smem>>
    %c0_0 = arith.constant 0 : index
    %c0_1 = arith.constant 0 : index
    %4 = vector.load %arg2[%c0_0, %c0_1] : memref<1x1024xf32, #tpu.memory_space<vmem>>, vector<1x1024xf32>
    %c0_2 = arith.constant 0 : index
    %c0_3 = arith.constant 0 : index
    %5 = vector.load %arg3[%c0_2, %c0_3] : memref<1x1024xf32, #tpu.memory_space<vmem>>, vector<1x1024xf32>
    %c0_4 = arith.constant 0 : index
    %c0_5 = arith.constant 0 : index
    %6 = vector.load %arg4[%c0_4, %c0_5] : memref<1x1024xf32, #tpu.memory_space<vmem>>, vector<1x1024xf32>
    %c0_i32 = arith.constant 0 : i32
    %c1_i32 = arith.constant 1 : i32
    %7 = arith.muli %c0_i32, %c1_i32 : i32
    %c0_i32_6 = arith.constant 0 : i32
    %8 = arith.addi %c0_i32_6, %7 : i32
    %c16_i32 = arith.constant 16 : i32
    %9 = arith.muli %8, %c16_i32 : i32
    %10 = tpu.assume_multiple %9, 16 : i32
    %11 = arith.index_cast %10 : i32 to index
    %c0_7 = arith.constant 0 : index
    %12 = vector.load %arg5[%11, %c0_7] : memref<16x1xf32, #tpu.memory_space<vmem>>, vector<16x1xf32>
    %13 = vector.broadcast %0 : f32 to vector<16x1xf32>
    %14 = arith.mulf %13, %12 : vector<16x1xf32>
    %15 = vector.broadcast %1 : f32 to vector<16x1xf32>
    %16 = arith.addf %14, %15 : vector<16x1xf32>
    %17 = vector.broadcast %16 : vector<16x1xf32> to vector<16x1024xf32>
    %18 = vector.broadcast %4 : vector<1x1024xf32> to vector<16x1024xf32>
    %19 = arith.mulf %17, %18 : vector<16x1024xf32>
    %20 = vector.broadcast %5 : vector<1x1024xf32> to vector<16x1024xf32>
    %21 = arith.addf %19, %20 : vector<16x1024xf32>
    %cst = arith.constant 0.000000e+00 : f32
    %22 = vector.broadcast %cst : f32 to vector<16x1024xf32>
    %23 = arith.subf %22, %21 : vector<16x1024xf32>
    %24 = math.exp %23 : vector<16x1024xf32>
    %cst_8 = arith.constant 1.000000e+00 : f32
    %25 = vector.broadcast %cst_8 : f32 to vector<16x1024xf32>
    %26 = arith.addf %25, %24 : vector<16x1024xf32>
    %cst_9 = arith.constant 1.000000e+00 : f32
    %27 = vector.broadcast %cst_9 : f32 to vector<16x1024xf32>
    %28 = arith.divf %27, %26 : vector<16x1024xf32>
    %29 = vector.broadcast %6 : vector<1x1024xf32> to vector<16x1024xf32>
    %30 = arith.mulf %28, %29 : vector<16x1024xf32>
    %cst_10 = arith.constant dense<0.000000e+00> : vector<16xf32>
    %31 = vector.multi_reduction <add>, %30, %cst_10 [1] : vector<16x1024xf32> to vector<16xf32>
    %32 = vector.shape_cast %31 : vector<16xf32> to vector<16x1xf32>
    %33 = arith.addf %16, %32 : vector<16x1xf32>
    %34 = vector.broadcast %3 : f32 to vector<16x1xf32>
    %35 = arith.mulf %34, %33 : vector<16x1xf32>
    %36 = vector.broadcast %2 : f32 to vector<16x1xf32>
    %37 = arith.addf %36, %35 : vector<16x1xf32>
    %38 = arith.index_cast %10 : i32 to index
    %c0_11 = arith.constant 0 : index
    %39 = vector.load %arg6[%38, %c0_11] : memref<16x1xf32, #tpu.memory_space<vmem>>, vector<16x1xf32>
    tpu.vector_store %arg6[%38, %c0_11], %37 {strides = array<i32>} : memref<16x1xf32, #tpu.memory_space<vmem>>, vector<16x1xf32>,
    %c1_i32_12 = arith.constant 1 : i32
    return
  }
  func.func @transform_0(%arg0: i32) -> i32 {
    %c0_i32 = arith.constant 0 : i32
    %c0_i32_0 = arith.constant 0 : i32
    return %c0_i32 : i32
  }
  func.func @transform_1(%arg0: i32) -> (i32, i32) {
    %c0_i32 = arith.constant 0 : i32
    %c0_i32_0 = arith.constant 0 : i32
    %c0_i32_1 = arith.constant 0 : i32
    return %c0_i32, %c0_i32_0 : i32, i32
  }
  func.func @transform_2(%arg0: i32) -> (i32, i32) {
    %c0_i32 = arith.constant 0 : i32
    %c0_i32_0 = arith.constant 0 : i32
    %c0_i32_1 = arith.constant 0 : i32
    return %c0_i32, %c0_i32_0 : i32, i32
  }
  func.func @transform_3(%arg0: i32) -> (i32, i32) {
    %c0_i32 = arith.constant 0 : i32
    %c0_i32_0 = arith.constant 0 : i32
    %c0_i32_1 = arith.constant 0 : i32
    return %c0_i32, %c0_i32_0 : i32, i32
  }
  func.func @transform_4(%arg0: i32) -> (i32, i32) {
    %c0_i32 = arith.constant 0 : i32
    %c0_i32_0 = arith.constant 0 : i32
    return %arg0, %c0_i32 : i32, i32
  }
  func.func @transform_5(%arg0: i32) -> (i32, i32) {
    %c0_i32 = arith.constant 0 : i32
    %c0_i32_0 = arith.constant 0 : i32
    return %arg0, %c0_i32 : i32, i32
  }
}

</mosaic_0001>

<bundles_post_ra>
// kernel: tpu_custom_call.1
= control target key start
LH: loop header
LB: loop body
LE: loop exit
PB: predicated region body
PF: predicated region fallthrough
CT: control target
= control target key end

     0   :  { %10 = vsyncpa [#allocation4], 0  ;;  %s600_s0 = inlined_call_operand.vmem [shape: f32[4], index: 0, kind: input, shape index: {}]   ;;  %s601_s1 = inlined_call_operand.vmem [shape: f32[1,1024], index: 1, kind: input, shape index: {}]   ;;  %s602_s2 = inlined_call_operand.vmem [shape: f32[1,1024], index: 2, kind: input, shape index: {}]   ;;  %s603_s3 = inlined_call_operand.hbm [shape: f32[1,1024], index: 3, kind: input, shape index: {}]   ;;  %s604_s4 = inlined_call_operand.vmem [shape: f32[16,1], index: 4, kind: input, shape index: {}]   ;;  %s605_s5 = inlined_call_operand.vmem [shape: f32[16,1], index: 5, kind: output, shape index: {}]  }
   0x1   :  { %s18_s20 = sshll.u32 %s600_s0, 4  ;;  %s19_s20 = int_to_ptr.vmem [resolvable:$true] %s18_s20 }
   0x2   :  { %11 = vsyncpa [#allocation3], 0  ;;  %s443_s21 = scalar_lea.vmem %s19_s20, 16  ;;  %p448_p1 = scmp.lt.s32.totalorder %s19_s20, %s19_s20 }
   0x3   :  { %p444_p0 = scmp.ne.s32.totalorder %s19_s20, %s443_s21  ;;  %p449_p2 = scmp.lt.s32.totalorder %s443_s21, %s443_s21 }
   0x5   :  { %p450_p3 = por %p449_p2, %p448_p1 }
   0x7   :  { %p451_p4 = pnand %p450_p3, %p444_p0 }
   0x9   :  { %454 = shalt.err (!%p451_p4)
}
   0xa   :  { %s479_s22 = smov [#allocation2]   ;;  %s480_s23 = smov [#allocation5]  }
   0xb   :  { %21 = dma.vmem_to_smem %s19_s20, 16, %s479_s22, [#allocation4]  }
   0xc   :  { %s32_s24 = sshll.u32 %s480_s23, 4  ;;  %s33_s24 = int_to_ptr.vmem [resolvable:$true] %s32_s24 }
   0xd   :  { %s463_s25 = scalar_lea.vmem %s33_s24, 128  ;;  %p468_p6 = scmp.lt.s32.totalorder %s33_s24, %s33_s24 }
   0xe   :  { %p464_p5 = scmp.ne.s32.totalorder %s33_s24, %s463_s25  ;;  %p469_p7 = scmp.lt.s32.totalorder %s463_s25, %s463_s25 }
  0x10   :  { %p470_p8 = por %p469_p7, %p468_p6 }
  0x12   :  { %p471_p9 = pnand %p470_p8, %p464_p5 }
  0x14   :  { %474 = shalt.err (!%p471_p9)
}
  0x15   :  { %35 = dma.hbm_to_vmem [thread:$0]  %s603_s3, 128, %s33_s24, [#allocation3]  }
  0x16   :  { %475 = dma.done.wait [#allocation4], 16  }
  0x17   :  { %476 = vsyncadd [#allocation4], 4294967280 }
  0x18   :  { %477 = dma.done.wait [#allocation3], 128  }
  0x19   :  { %478 = vsyncadd [#allocation3], 4294967168 }
  0x1a   :  { %44 = sfence }
  0x1b   :  { %s45_s27 = sld [smem:[#allocation2]]  ;;  %v481_v0 = vmov 0   ;;  %v52_v1 = vld [vmem:[%s604_s4] sm:$0xff]  ;;  %v53_v2 = vld [vmem:[%s604_s4 + $0x8] sm:$0xff]  ;;  %v71_v9 = vlaneseq  ;;  %vm363_vm0 = vcmask 7168  }
  0x1c   :  { %378 = vset.pattern.permute.xlu0 %v481_v0  ;;  %s372_s28 = sld [smem:[#allocation2 + $0x1]]  ;;  %v49_v15 = vld [vmem:[%s601_s1] sm:$0xff] }
  0x1d   :  { %v72_v10 = vshrl.u32 %v71_v9, 7  ;;  %v50_v20 = vld [vmem:[%s602_s2] sm:$0xff]  ;;  %s374_s1 = sld [smem:[#allocation2 + $0x3]] }
  0x1e   :  { %s373_s2 = sld [smem:[#allocation2 + $0x2]] }
  0x1f   :  { %v530_v11 = vsub.s32 0, %v72_v10  ;;  %v532_v12 = vsub.s32 1, %v72_v10  ;;  %v534_v13 = vsub.s32 2, %v72_v10  ;;  %v536_v14 = vsub.s32 3, %v72_v10 }
  0x20   :  { %v541_v16 = vsub.s32 4, %v72_v10  ;;  %v543_v17 = vsub.s32 5, %v72_v10  ;;  %v545_v18 = vsub.s32 6, %v72_v10  ;;  %v547_v19 = vsub.s32 7, %v72_v10 }
  0x21   :  { %v54_v3 = vstv %s45_s27  ;;  %v74_v21 = vrot.slane %v49_v15, %v530_v11  ;;  %v78_v22 = vrot.slane %v49_v15, %v532_v12  ;;  %v82_v23 = vrot.slane %v49_v15, %v534_v13 }
  0x22   :  { %v55_v4 = vmul.f32 %v54_v3, %v52_v1  ;;  %v56_v5 = vmul.f32 %v54_v3, %v53_v2  ;;  %v57_v6 = vstv %s372_s28  ;;  %v86_v24 = vrot.slane %v49_v15, %v536_v14 }
  0x23   :  { %v90_v25 = vrot.slane %v49_v15, %v541_v16  ;;  %v94_v26 = vrot.slane %v49_v15, %v543_v17  ;;  %v559_v27 = vrot.slane %v49_v15, %v545_v18  ;;  %v562_v28 = vrot.slane %v49_v15, %v547_v19 }
  0x24   :  { %v524_v7 = vadd.f32 %v57_v6, %v55_v4  ;;  %v526_v8 = vadd.f32 %v57_v6, %v56_v5  ;;  %v131_v29 = vrot.slane %v50_v20, %v530_v11  ;;  %v135_v30 = vrot.slane %v50_v20, %v532_v12 }
  0x25   :  { %v139_v31 = vrot.slane %v50_v20, %v534_v13  ;;  %v143_v32 = vrot.slane %v50_v20, %v536_v14  ;;  %v147_v34 = vrot.slane %v50_v20, %v541_v16  ;;  %v151_v35 = vrot.slane %v50_v20, %v543_v17 }
  0x26   :  { %62 = vperm.xlu0 %378, %v524_v7   ;;  %v571_v36 = vrot.slane %v50_v20, %v545_v18  ;;  %v574_v37 = vrot.slane %v50_v20, %v547_v19 }
  0x2a   :  { %67 = vperm.xlu0 %378, %v526_v8  }
  0xa1   :  { %v63_v33 = vpop.permute.xlu0 %62 }
  0xa2   :  { %v111_v38 = vmul.f32 %v74_v21, %v63_v33  ;;  %v112_v39 = vmul.f32 %v78_v22, %v63_v33  ;;  %v113_v40 = vmul.f32 %v82_v23, %v63_v33  ;;  %v114_v41 = vmul.f32 %v86_v24, %v63_v33 }
  0xa3   :  { %v115_v42 = vmul.f32 %v90_v25, %v63_v33  ;;  %v116_v43 = vmul.f32 %v94_v26, %v63_v33  ;;  %v117_v44 = vmul.f32 %v559_v27, %v63_v33  ;;  %v118_v45 = vmul.f32 %v562_v28, %v63_v33 }
  0xa4   :  { %v168_v46 = vadd.f32 %v131_v29, %v111_v38  ;;  %v169_v47 = vadd.f32 %v135_v30, %v112_v39  ;;  %v170_v48 = vadd.f32 %v139_v31, %v113_v40  ;;  %v171_v49 = vadd.f32 %v143_v32, %v114_v41 }
  0xa5   :  { %v68_v50 = vpop.permute.xlu0 %67  ;;  %v172_v51 = vadd.f32 %v147_v34, %v115_v42  ;;  %v173_v52 = vadd.f32 %v151_v35, %v116_v43  ;;  %v174_v53 = vadd.f32 %v571_v36, %v117_v44  ;;  %v175_v54 = vadd.f32 %v574_v37, %v118_v45 }
  0xa6   :  { %v184_v55 = vsub.f32 0.0, %v168_v46  ;;  %v185_v56 = vsub.f32 0.0, %v169_v47  ;;  %v186_v57 = vsub.f32 0.0, %v170_v48  ;;  %v187_v58 = vsub.f32 0.0, %v171_v49 }
  0xa7   :  { %v119_v59 = vmul.f32 %v74_v21, %v68_v50  ;;  %v120_v60 = vmul.f32 %v78_v22, %v68_v50  ;;  %v121_v61 = vmul.f32 %v82_v23, %v68_v50  ;;  %v122_v62 = vmul.f32 %v86_v24, %v68_v50 }
  0xa8   :  { %v200_v63 = vmul.f32 1.442695, %v184_v55  ;;  %v202_v0 = vmul.f32 1.442695, %v185_v56  ;;  %v204_v1 = vmul.f32 1.442695, %v186_v57  ;;  %v123_v2 = vmul.f32 %v90_v25, %v68_v50 }
  0xa9   :  { %v206_v3 = vmul.f32 1.442695, %v187_v58  ;;  %v176_v4 = vadd.f32 %v131_v29, %v119_v59  ;;  %v177_v5 = vadd.f32 %v135_v30, %v120_v60  ;;  %v178_v6 = vadd.f32 %v139_v31, %v121_v61 }
  0xaa   :  { %379 = vpow2.f32 %v200_v63  ;;  %v179_v9 = vadd.f32 %v143_v32, %v122_v62  ;;  %v188_v10 = vsub.f32 0.0, %v172_v51  ;;  %v189_v15 = vsub.f32 0.0, %v173_v52 }
  0xab   :  { %381 = vpow2.f32 %v202_v0  ;;  %v192_v20 = vsub.f32 0.0, %v176_v4  ;;  %v193_v33 = vsub.f32 0.0, %v177_v5  ;;  %v194_v38 = vsub.f32 0.0, %v178_v6 }
  0xac   :  { %383 = vpow2.f32 %v204_v1  ;;  %v195_v21 = vsub.f32 0.0, %v179_v9  ;;  %v190_v22 = vsub.f32 0.0, %v174_v53  ;;  %v191_v23 = vsub.f32 0.0, %v175_v54 }
  0xad   :  { %385 = vpow2.f32 %v206_v3  ;;  %v216_v24 = vmul.f32 1.442695, %v192_v20  ;;  %v218_v39 = vmul.f32 1.442695, %v193_v33  ;;  %v220_v25 = vmul.f32 1.442695, %v194_v38 }
  0xae   :  { %v222_v40 = vmul.f32 1.442695, %v195_v21  ;;  %v124_v29 = vmul.f32 %v94_v26, %v68_v50  ;;  %v208_v30 = vmul.f32 1.442695, %v188_v10  ;;  %v210_v31 = vmul.f32 1.442695, %v189_v15 }
  0xaf   :  { %387 = vpow2.f32 %v216_v24  ;;  %v125_v32 = vmul.f32 %v559_v27, %v68_v50  ;;  %v126_v41 = vmul.f32 %v562_v28, %v68_v50  ;;  %v180_v42 = vadd.f32 %v147_v34, %v123_v2  ;;  %v51_v3 = vld [vmem:[#allocation5] sm:$0xff] }
  0xb0   :  { %389 = vpow2.f32 %v218_v39  ;;  %v181_v43 = vadd.f32 %v151_v35, %v124_v29  ;;  %v212_v44 = vmul.f32 1.442695, %v190_v22  ;;  %v214_v45 = vmul.f32 1.442695, %v191_v23 }
  0xb1   :  { %391 = vpow2.f32 %v220_v25  ;;  %v182_v46 = vadd.f32 %v571_v36, %v125_v32  ;;  %v183_v47 = vadd.f32 %v574_v37, %v126_v41  ;;  %v196_v48 = vsub.f32 0.0, %v180_v42 }
  0xb2   :  { %393 = vpow2.f32 %v222_v40  ;;  %v197_v26 = vsub.f32 0.0, %v181_v43  ;;  %v284_v33 = vrot.slane %v51_v3, %v530_v11  ;;  %v288_v21 = vrot.slane %v51_v3, %v532_v12 }
  0xb3   :  { %395 = vpow2.f32 %v208_v30  ;;  %v198_v49 = vsub.f32 0.0, %v182_v46  ;;  %v224_v51 = vmul.f32 1.442695, %v196_v48  ;;  %v199_v28 = vsub.f32 0.0, %v183_v47 }
  0xb4   :  { %397 = vpow2.f32 %v210_v31  ;;  %v226_v27 = vmul.f32 1.442695, %v197_v26  ;;  %v292_v25 = vrot.slane %v51_v3, %v534_v13  ;;  %v296_v32 = vrot.slane %v51_v3, %v536_v14 }
  0xb5   :  { %399 = vpow2.f32 %v212_v44  ;;  %v228_v52 = vmul.f32 1.442695, %v198_v49  ;;  %v230_v55 = vmul.f32 1.442695, %v199_v28  ;;  %v300_v47 = vrot.slane %v51_v3, %v541_v16 }
  0xb6   :  { %401 = vpow2.f32 %v214_v45  ;;  %v304_v14 = vrot.slane %v51_v3, %v543_v17 }
  0xb7   :  { %v380_v34 = vpop.eup %379  ;;  %403 = vpow2.f32 %v224_v51 }
  0xb8   :  { %v382_v35 = vpop.eup %381  ;;  %v232_v50 = vadd.f32 1.0, %v380_v34  ;;  %405 = vpow2.f32 %v226_v27 }
  0xb9   :  { %v384_v36 = vpop.eup %383  ;;  %v233_v53 = vadd.f32 1.0, %v382_v35  ;;  %407 = vpow2.f32 %v228_v52 }
  0xba   :  { %v386_v37 = vpop.eup %385  ;;  %409 = vrcp.f32 %v232_v50  ;;  %v234_v54 = vadd.f32 1.0, %v384_v36  ;;  %v308_v36 = vrot.slane %v51_v3, %v545_v18 }
  0xbb   :  { %411 = vrcp.f32 %v233_v53  ;;  %v235_v56 = vadd.f32 1.0, %v386_v37 }
  0xbc   :  { %v388_v57 = vpop.eup %387  ;;  %413 = vrcp.f32 %v234_v54 }
  0xbd   :  { %v390_v58 = vpop.eup %389  ;;  %v240_v59 = vadd.f32 1.0, %v388_v57  ;;  %415 = vrcp.f32 %v235_v56  ;;  %v312_v56 = vrot.slane %v51_v3, %v547_v19 }
  0xbe   :  { %v392_v60 = vpop.eup %391  ;;  %v241_v61 = vadd.f32 1.0, %v390_v58  ;;  %417 = vpow2.f32 %v230_v55 }
  0xbf   :  { %v394_v62 = vpop.eup %393  ;;  %v242_v63 = vadd.f32 1.0, %v392_v60  ;;  %419 = vrcp.f32 %v240_v59 }
  0xc0   :  { %v396_v0 = vpop.eup %395  ;;  %v243_v1 = vadd.f32 1.0, %v394_v62  ;;  %421 = vrcp.f32 %v241_v61 }
  0xc1   :  { %v398_v2 = vpop.eup %397  ;;  %423 = vrcp.f32 %v242_v63  ;;  %v236_v4 = vadd.f32 1.0, %v396_v0 }
  0xc2   :  { %v400_v5 = vpop.eup %399  ;;  %425 = vrcp.f32 %v243_v1  ;;  %v237_v6 = vadd.f32 1.0, %v398_v2 }
  0xc3   :  { %v402_v9 = vpop.eup %401  ;;  %v238_v10 = vadd.f32 1.0, %v400_v5  ;;  %427 = vrcp.f32 %v236_v4 }
  0xc4   :  { %v404_v15 = vpop.eup %403  ;;  %v239_v20 = vadd.f32 1.0, %v402_v9  ;;  %429 = vrcp.f32 %v237_v6 }
  0xc5   :  { %v406_v38 = vpop.eup %405  ;;  %431 = vrcp.f32 %v238_v10  ;;  %v244_v22 = vadd.f32 1.0, %v404_v15 }
  0xc6   :  { %v408_v23 = vpop.eup %407  ;;  %433 = vrcp.f32 %v239_v20  ;;  %v245_v24 = vadd.f32 1.0, %v406_v38  ;;  %v357_v20 = vstv %s374_s1 }
  0xc7   :  { %v410_v39 = vpop.eup %409  ;;  %v246_v40 = vadd.f32 1.0, %v408_v23  ;;  %435 = vrcp.f32 %v244_v22 }
  0xc8   :  { %v412_v29 = vpop.eup %411  ;;  %v321_v30 = vmul.f32 %v410_v39, %v284_v33  ;;  %437 = vrcp.f32 %v245_v24 }
  0xc9   :  { %v414_v31 = vpop.eup %413  ;;  %v322_v11 = vmul.f32 %v412_v29, %v288_v21  ;;  %439 = vrcp.f32 %v246_v40 }
  0xca   :  { %v416_v41 = vpop.eup %415  ;;  %v323_v12 = vmul.f32 %v414_v31, %v292_v25 }
  0xcb   :  { %v418_v42 = vpop.eup %417  ;;  %v337_v43 = vadd.f32 %v322_v11, %v321_v30  ;;  %v324_v13 = vmul.f32 %v416_v41, %v296_v32 }
  0xcc   :  { %v420_v44 = vpop.eup %419  ;;  %v247_v45 = vadd.f32 1.0, %v418_v42 }
  0xcd   :  { %v422_v46 = vpop.eup %421  ;;  %v338_v48 = vadd.f32 %v337_v43, %v323_v12  ;;  %v329_v26 = vmul.f32 %v420_v44, %v284_v33 }
  0xce   :  { %v424_v49 = vpop.eup %423  ;;  %441 = vrcp.f32 %v247_v45  ;;  %v330_v51 = vmul.f32 %v422_v46, %v288_v21  ;;  %v360_v21 = vstv %s373_s2 }
  0xcf   :  { %v426_v27 = vpop.eup %425  ;;  %v339_v52 = vadd.f32 %v338_v48, %v324_v13  ;;  %v331_v34 = vmul.f32 %v424_v49, %v292_v25 }
  0xd0   :  { %v428_v28 = vpop.eup %427  ;;  %v346_v35 = vadd.f32 %v330_v51, %v329_v26  ;;  %v332_v54 = vmul.f32 %v426_v27, %v296_v32 }
  0xd1   :  { %v430_v50 = vpop.eup %429  ;;  %v325_v53 = vmul.f32 %v428_v28, %v300_v47 }
  0xd2   :  { %v432_v37 = vpop.eup %431  ;;  %v347_v16 = vadd.f32 %v346_v35, %v331_v34  ;;  %v326_v57 = vmul.f32 %v430_v50, %v304_v14 }
  0xd3   :  { %v434_v55 = vpop.eup %433  ;;  %v340_v58 = vadd.f32 %v339_v52, %v325_v53  ;;  %v327_v17 = vmul.f32 %v432_v37, %v308_v36 }
  0xd4   :  { %v436_v59 = vpop.eup %435  ;;  %v348_v60 = vadd.f32 %v347_v16, %v332_v54  ;;  %v328_v1 = vmul.f32 %v434_v55, %v312_v56 }
  0xd5   :  { %v438_v61 = vpop.eup %437  ;;  %v341_v62 = vadd.f32 %v340_v58, %v326_v57  ;;  %v333_v63 = vmul.f32 %v436_v59, %v300_v47 }
  0xd6   :  { %v440_v0 = vpop.eup %439  ;;  %v334_v4 = vmul.f32 %v438_v61, %v304_v14 }
  0xd7   :  { %v342_v2 = vadd.f32 %v341_v62, %v327_v17  ;;  %v349_v18 = vadd.f32 %v348_v60, %v333_v63  ;;  %v335_v6 = vmul.f32 %v440_v0, %v308_v36 }
  0xd9   :  { %v343_v5 = vadd.f32 %v342_v2, %v328_v1  ;;  %v350_v9 = vadd.f32 %v349_v18, %v334_v4 }
  0xdb   :  { %v442_v10 = vpop.eup %441  ;;  %344 = vadd.xlane.f32.xlu1 %v343_v5  ;;  %v351_v15 = vadd.f32 %v350_v9, %v335_v6 }
  0xdc   :  { %v336_v19 = vmul.f32 %v442_v10, %v312_v56 }
  0xde   :  { %v352_v3 = vadd.f32 %v351_v15, %v336_v19 }
  0xe0   :  { %353 = vadd.xlane.f32.xlu1 %v352_v3 }
 0x164   :  { %v345_v33 = vpop.xlane.xlu1 %344 }
 0x165   :  { %v355_v38 = vadd.f32 %v345_v33, %v524_v7 }
 0x167   :  { %v358_v22 = vmul.f32 %v357_v20, %v355_v38 }
 0x169   :  { %v361_v23 = vadd.f32 %v360_v21, %v358_v22  ;;  %v354_v24 = vpop.xlane.xlu1 %353 }
 0x16a   :  { %v356_v39 = vadd.f32 %v354_v24, %v526_v8 }
 0x16b   :  { %364 = vst.msk [vmem:[%s605_s5] sm:$0xff] %vm363_vm0, %v361_v23 }
 0x16c   :  { %v359_v25 = vmul.f32 %v357_v20, %v356_v39 }
 0x16e   :  { %v362_v40 = vadd.f32 %v360_v21, %v359_v25 }
 0x170   :  { %365 = vst.msk [vmem:[%s605_s5 + $0x8] sm:$0xff] %vm363_vm0, %v362_v40 }
 0x171   :  { %370 = vsyncpa [#allocation3], 1 }
 0x172   :  { %371 = vsyncpa [#allocation4], 1 }

</bundles_post_ra>
